<compile_context>
chip_gen: v7x
topology: tpu7x:2x2x1
jax: 0.10.0
libtpu: 0.0.40
codegen_flags: <defaults>
</compile_context>

<pallas_src>
import jax
import jax.numpy as jnp
from jax import lax
from jax.experimental import pallas as pl
from jax.experimental.pallas import tpu as pltpu


def _self_attention_kernel(q_ref, val_ref, w1_ref, b1_ref, vw_ref, vb_ref,
                           ctx_ref, score_ref):
    # Per-batch block (grid axis 0 == batch, "parallel"):
    #   q_ref:   (S, Din)     val_ref:   (S, Dv)
    #   w1_ref:  (Dout, Din)  b1_ref:    (Dout, 1)
    #   vw_ref:  (Dout, 1)    vb_ref:    (1,) in SMEM
    #   ctx_ref: (1, Dv)      score_ref: (1, S)   (lane-dense, seq on lanes)

    # h^T = tanh(W1 @ q^T + b1): contract Din-with-Din in-kernel (no wrapper
    # transpose); native-dtype operands feed the MXU, accumulation in f32.
    hT = jnp.tanh(
        lax.dot_general(w1_ref[...], q_ref[...],
                        dimension_numbers=(((1,), (1,)), ((), ())),
                        preferred_element_type=jnp.float32)
        + b1_ref[...])                                            # (Dout, S)

    # V(.) has a single output unit: VPU multiply + sublane (XLU) reduction
    # instead of an N=1 MXU matmul.
    logits = jnp.sum(hT * vw_ref[...], axis=0, keepdims=True) + vb_ref[0]
    s = jax.nn.sigmoid(logits)                                    # (1, S)

    # Unnormalized weighted sum of values (one small MXU matmul); fold the
    # per-batch normalization into the tiny (1, Dv) result.
    denom = jnp.sum(s, axis=-1, keepdims=True)                    # (1, 1)
    ctx_unnorm = jnp.dot(s, val_ref[...],
                         preferred_element_type=jnp.float32)      # (1, Dv)
    ctx_ref[...] = (ctx_unnorm
                    * pl.reciprocal(denom, approx=False)).astype(ctx_ref.dtype)
    score_ref[...] = s.astype(score_ref.dtype)


def self_attention_pallas(query, values, w1, b1, v_w, v_b):
    """query: (B,S,Din), values: (B,S,Dv).
    w1: (Dout, Din), b1: (Dout,)  -- PyTorch nn.Linear layout
    v_w: (1, Dout),  v_b: (1,)
    Returns (context_vector (B,Dv), score (B,S,1))."""
    B, S, Din = query.shape
    Dv = values.shape[-1]
    Dout = w1.shape[0]

    # Keep native dtypes (no forced f32 upcasts). Only the SMEM scalar is
    # pinned to a 32-bit type.
    w1_m = jnp.asarray(w1)                                  # (Dout, Din)
    b1_col = jnp.asarray(b1).reshape(Dout, 1)               # (Dout, 1)
    vw_col = jnp.asarray(v_w).reshape(Dout, 1)              # (Dout, 1)
    vb_1 = jnp.asarray(v_b, jnp.float32).reshape(1)         # (1,) scalar in SMEM

    ctx3, score3 = pl.pallas_call(
        _self_attention_kernel,
        grid=(B,),
        out_shape=(
            jax.ShapeDtypeStruct((B, 1, Dv), jnp.float32),
            jax.ShapeDtypeStruct((B, 1, S), jnp.float32),
        ),
        in_specs=[
            pl.BlockSpec((None, S, Din), lambda b: (b, 0, 0)),   # query tile
            pl.BlockSpec((None, S, Dv), lambda b: (b, 0, 0)),    # values tile
            pl.BlockSpec((Dout, Din), lambda b: (0, 0)),         # W1 (resident)
            pl.BlockSpec((Dout, 1), lambda b: (0, 0)),           # b1
            pl.BlockSpec((Dout, 1), lambda b: (0, 0)),           # V weight
            pl.BlockSpec(memory_space=pltpu.MemorySpace.SMEM),   # V bias scalar
        ],
        out_specs=(
            pl.BlockSpec((None, 1, Dv), lambda b: (b, 0, 0)),    # context row
            pl.BlockSpec((None, 1, S), lambda b: (b, 0, 0)),     # score row
        ),
        compiler_params=pltpu.CompilerParams(
            dimension_semantics=("parallel",)),
    )(query, values, w1_m, b1_col, vw_col, vb_1)

    # (B,1,Dv)->(B,Dv) and (B,1,S)->(B,S,1): pure reshapes, no transpose.
    return ctx3.reshape(B, Dv), score3.reshape(B, S, 1)


def self_attention_ref(query, values, w1, b1, v_w, v_b):
    """Plain-JAX reference matching the PyTorch forward exactly."""
    h = jnp.tanh(jnp.einsum("bsd,od->bso", query, w1) + b1)          # W1(query)
    score = jax.nn.sigmoid(jnp.einsum("bso,ko->bsk", h, v_w) + v_b)  # V(.)
    attn = score / jnp.sum(score, axis=1, keepdims=True)
    ctx = jnp.sum(attn * values, axis=1)
    return ctx, score


if __name__ == "__main__":
    # Module dims: in_units=32, out_units=16; values feature dim = 32.
    B, S, IN_UNITS, OUT_UNITS, DV = 2, 8, 32, 16, 32

    key = jax.random.PRNGKey(0)
    kq, kv, kw1, kb1, kvw, kvb = jax.random.split(key, 6)

    query = jax.random.normal(kq, (B, S, IN_UNITS), jnp.float32)
    values = jax.random.normal(kv, (B, S, DV), jnp.float32)

    # Deterministic synthetic parameters (nn.Linear shapes: weight (out,in), bias (out,))
    bound1 = 1.0 / jnp.sqrt(IN_UNITS)
    w1 = jax.random.uniform(kw1, (OUT_UNITS, IN_UNITS), jnp.float32, -bound1, bound1)
    b1 = jax.random.uniform(kb1, (OUT_UNITS,), jnp.float32, -bound1, bound1)
    bound2 = 1.0 / jnp.sqrt(OUT_UNITS)
    v_w = jax.random.uniform(kvw, (1, OUT_UNITS), jnp.float32, -bound2, bound2)
    v_b = jax.random.uniform(kvb, (1,), jnp.float32, -bound2, bound2)

    ctx, score = self_attention_pallas(query, values, w1, b1, v_w, v_b)
    jax.block_until_ready((ctx, score))

    ctx_ref, score_ref = self_attention_ref(query, values, w1, b1, v_w, v_b)

    assert ctx.shape == (B, DV) and score.shape == (B, S, 1)
    assert jnp.allclose(ctx, ctx_ref, atol=1e-5, rtol=1e-5)
    assert jnp.allclose(score, score_ref, atol=1e-5, rtol=1e-5)
    print("KERNEL_OK")
</pallas_src>

<mosaic_0001>
module attributes {stable_mosaic.version = 11 : i64} {
  func.func @_self_attention_kernel(%arg0: i32, %arg1: memref<1x8x32xf32, #tpu.memory_space<vmem>>, %arg2: memref<1x8x32xf32, #tpu.memory_space<vmem>>, %arg3: memref<16x32xf32, #tpu.memory_space<vmem>>, %arg4: memref<16x1xf32, #tpu.memory_space<vmem>>, %arg5: memref<16x1xf32, #tpu.memory_space<vmem>>, %arg6: memref<1xf32, #tpu.memory_space<smem>>, %arg7: memref<1x1x32xf32, #tpu.memory_space<vmem>>, %arg8: memref<1x1x8xf32, #tpu.memory_space<vmem>>) attributes {dimension_semantics = [#tpu.dimension_semantics<parallel>], iteration_bounds = array<i64: 2>, scalar_prefetch = 0 : i64, scratch_operands = 0 : i64, tpu.core_type = #tpu.core_type<tc>, window_params = [{transform_indices = @transform_0, window_bounds = array<i64: 1, 8, 32>}, {transform_indices = @transform_1, window_bounds = array<i64: 1, 8, 32>}, {pipeline_mode = #tpu.pipeline_mode<synchronous>, transform_indices = @transform_2, window_bounds = array<i64: 16, 32>}, {pipeline_mode = #tpu.pipeline_mode<synchronous>, transform_indices = @transform_3, window_bounds = array<i64: 16, 1>}, {pipeline_mode = #tpu.pipeline_mode<synchronous>, transform_indices = @transform_4, window_bounds = array<i64: 16, 1>}, {transform_indices = @transform_5, window_bounds = array<i64: 1>}, {transform_indices = @transform_6, window_bounds = array<i64: 1, 1, 32>}, {transform_indices = @transform_7, window_bounds = array<i64: 1, 1, 8>}]} {
    %c0 = arith.constant 0 : index
    %c0_0 = arith.constant 0 : index
    %0 = vector.load %arg3[%c0, %c0_0] : memref<16x32xf32, #tpu.memory_space<vmem>>, vector<16x32xf32>
    %c0_1 = arith.constant 0 : index
    %c0_2 = arith.constant 0 : index
    %c0_3 = arith.constant 0 : index
    %1 = vector.load %arg1[%c0_1, %c0_2, %c0_3] : memref<1x8x32xf32, #tpu.memory_space<vmem>>, vector<1x8x32xf32>
    %2 = vector.shape_cast %1 : vector<1x8x32xf32> to vector<8x32xf32>
    %cst = arith.constant dense<0.000000e+00> : vector<16x8xf32>
    %3 = tpu.matmul %0, %2, %cst {dimension_numbers = #tpu.dot_dimension_numbers<[1], [1], [0], [0], [0, 0, 1, 0], [], []>} : vector<16x32xf32>, vector<8x32xf32>, vector<16x8xf32> -> vector<16x8xf32>
    %c0_4 = arith.constant 0 : index
    %c0_5 = arith.constant 0 : index
    %4 = vector.load %arg4[%c0_4, %c0_5] : memref<16x1xf32, #tpu.memory_space<vmem>>, vector<16x1xf32>
    %5 = vector.broadcast %4 : vector<16x1xf32> to vector<16x8xf32>
    %6 = arith.addf %3, %5 : vector<16x8xf32>
    %7 = math.tanh %6 : vector<16x8xf32>
    %c0_6 = arith.constant 0 : index
    %c0_7 = arith.constant 0 : index
    %8 = vector.load %arg5[%c0_6, %c0_7] : memref<16x1xf32, #tpu.memory_space<vmem>>, vector<16x1xf32>
    %9 = vector.broadcast %8 : vector<16x1xf32> to vector<16x8xf32>
    %10 = arith.mulf %7, %9 : vector<16x8xf32>
    %cst_8 = arith.constant dense<0.000000e+00> : vector<8xf32>
    %11 = vector.multi_reduction <add>, %10, %cst_8 [0] : vector<16x8xf32> to vector<8xf32>
    %12 = vector.shape_cast %11 : vector<8xf32> to vector<1x8xf32>
    %c0_9 = arith.constant 0 : index
    %13 = memref.load %arg6[%c0_9] : memref<1xf32, #tpu.memory_space<smem>>
    %14 = vector.broadcast %13 : f32 to vector<1x8xf32>
    %15 = arith.addf %12, %14 : vector<1x8xf32>
    %16 = arith.negf %15 : vector<1x8xf32>
    %17 = math.exp %16 : vector<1x8xf32>
    %cst_10 = arith.constant 1.000000e+00 : f32
    %18 = vector.broadcast %cst_10 : f32 to vector<1x8xf32>
    %19 = arith.addf %18, %17 : vector<1x8xf32>
    %20 = arith.divf %18, %19 : vector<1x8xf32>
    %cst_11 = arith.constant dense<0.000000e+00> : vector<1xf32>
    %21 = vector.multi_reduction <add>, %20, %cst_11 [1] : vector<1x8xf32> to vector<1xf32>
    %22 = vector.shape_cast %21 : vector<1xf32> to vector<1x1xf32>
    %c0_12 = arith.constant 0 : index
    %c0_13 = arith.constant 0 : index
    %c0_14 = arith.constant 0 : index
    %23 = vector.load %arg2[%c0_12, %c0_13, %c0_14] : memref<1x8x32xf32, #tpu.memory_space<vmem>>, vector<1x8x32xf32>
    %24 = vector.shape_cast %23 : vector<1x8x32xf32> to vector<8x32xf32>
    %cst_15 = arith.constant dense<0.000000e+00> : vector<1x32xf32>
    %25 = tpu.matmul %20, %24, %cst_15 {dimension_numbers = #tpu.dot_dimension_numbers<[1], [0], [0], [1], [0, 0, 1, 1], [], []>} : vector<1x8xf32>, vector<8x32xf32>, vector<1x32xf32> -> vector<1x32xf32>
    %26 = tpu.reciprocal %22 : vector<1x1xf32> -> vector<1x1xf32>
    %27 = vector.broadcast %26 : vector<1x1xf32> to vector<1x32xf32>
    %28 = arith.mulf %25, %27 : vector<1x32xf32>
    %c0_16 = arith.constant 0 : index
    %c0_17 = arith.constant 0 : index
    %c0_18 = arith.constant 0 : index
    %29 = vector.load %arg7[%c0_16, %c0_17, %c0_18] : memref<1x1x32xf32, #tpu.memory_space<vmem>>, vector<1x1x32xf32>
    %30 = vector.shape_cast %29 : vector<1x1x32xf32> to vector<1x32xf32>
    %31 = vector.shape_cast %28 : vector<1x32xf32> to vector<1x1x32xf32>
    tpu.vector_store %arg7[%c0_16, %c0_17, %c0_18], %31 {strides = array<i32>} : memref<1x1x32xf32, #tpu.memory_space<vmem>>, vector<1x1x32xf32>,
    %c0_19 = arith.constant 0 : index
    %c0_20 = arith.constant 0 : index
    %c0_21 = arith.constant 0 : index
    %32 = vector.load %arg8[%c0_19, %c0_20, %c0_21] : memref<1x1x8xf32, #tpu.memory_space<vmem>>, vector<1x1x8xf32>
    %33 = vector.shape_cast %32 : vector<1x1x8xf32> to vector<1x8xf32>
    %34 = vector.shape_cast %20 : vector<1x8xf32> to vector<1x1x8xf32>
    tpu.vector_store %arg8[%c0_19, %c0_20, %c0_21], %34 {strides = array<i32>} : memref<1x1x8xf32, #tpu.memory_space<vmem>>, vector<1x1x8xf32>,
    return
  }
  func.func @transform_0(%arg0: i32) -> (i32, i32, i32) {
    %c0_i32 = arith.constant 0 : i32
    %c0_i32_0 = arith.constant 0 : i32
    %c0_i32_1 = arith.constant 0 : i32
    return %arg0, %c0_i32, %c0_i32_0 : i32, i32, i32
  }
  func.func @transform_1(%arg0: i32) -> (i32, i32, i32) {
    %c0_i32 = arith.constant 0 : i32
    %c0_i32_0 = arith.constant 0 : i32
    %c0_i32_1 = arith.constant 0 : i32
    return %arg0, %c0_i32, %c0_i32_0 : i32, i32, i32
  }
  func.func @transform_2(%arg0: i32) -> (i32, i32) {
    %c0_i32 = arith.constant 0 : i32
    %c0_i32_0 = arith.constant 0 : i32
    %c0_i32_1 = arith.constant 0 : i32
    return %c0_i32, %c0_i32_0 : i32, i32
  }
  func.func @transform_3(%arg0: i32) -> (i32, i32) {
    %c0_i32 = arith.constant 0 : i32
    %c0_i32_0 = arith.constant 0 : i32
    %c0_i32_1 = arith.constant 0 : i32
    return %c0_i32, %c0_i32_0 : i32, i32
  }
  func.func @transform_4(%arg0: i32) -> (i32, i32) {
    %c0_i32 = arith.constant 0 : i32
    %c0_i32_0 = arith.constant 0 : i32
    %c0_i32_1 = arith.constant 0 : i32
    return %c0_i32, %c0_i32_0 : i32, i32
  }
  func.func @transform_5(%arg0: i32) -> i32 {
    %c0_i32 = arith.constant 0 : i32
    %c0_i32_0 = arith.constant 0 : i32
    return %c0_i32 : i32
  }
  func.func @transform_6(%arg0: i32) -> (i32, i32, i32) {
    %c0_i32 = arith.constant 0 : i32
    %c0_i32_0 = arith.constant 0 : i32
    %c0_i32_1 = arith.constant 0 : i32
    return %arg0, %c0_i32, %c0_i32_0 : i32, i32, i32
  }
  func.func @transform_7(%arg0: i32) -> (i32, i32, i32) {
    %c0_i32 = arith.constant 0 : i32
    %c0_i32_0 = arith.constant 0 : i32
    %c0_i32_1 = arith.constant 0 : i32
    return %arg0, %c0_i32, %c0_i32_0 : i32, i32, i32
  }
}

</mosaic_0001>

<bundles_post_ra>
// kernel: tpu_custom_call.1
= control target key start
LH: loop header
LB: loop body
LE: loop exit
PB: predicated region body
PF: predicated region fallthrough
CT: control target
= control target key end

     0   :  { %s1140_s0 = inlined_call_operand.vmem [shape: f32[2,8,32], index: 0, kind: input, shape index: {}]   ;;  %s1141_s1 = inlined_call_operand.vmem [shape: f32[2,8,32], index: 1, kind: input, shape index: {}]   ;;  %s1142_s2 = inlined_call_operand.hbm [shape: f32[16,32], index: 2, kind: input, shape index: {}]   ;;  %s1143_s3 = inlined_call_operand.vmem [shape: f32[16,1], index: 3, kind: input, shape index: {}]   ;;  %s1144_s4 = inlined_call_operand.vmem [shape: f32[16,1], index: 4, kind: input, shape index: {}]   ;;  %s1145_s5 = inlined_call_operand.<no memory space> [shape: f32[1], index: 5, kind: input, shape index: {}]   ;;  %s1146_s6 = inlined_call_operand.hbm [shape: f32[2,1,32], index: 6, kind: output, shape index: {0}]   ;;  %s1147_s7 = inlined_call_operand.hbm [shape: f32[2,1,8], index: 7, kind: output, shape index: {1}]  }
   0x1   :  { %13 = sst [smem:[#allocation2]] %s1145_s5 }
   0x2   :  { %14 = vsyncpa [#allocation4], 0 }
   0x3   :  { %15 = vsyncpa [#allocation5], 0 }
   0x4   :  { %17 = vsyncpa [#allocation5 + $0x1], 0 }
   0x5   :  { %18 = vsyncpa [#allocation8], 0 }
   0x6   :  { %20 = vsyncpa [#allocation8 + $0x1], 0  ;;  %s954_s26 = smov 0   ;;  %s956_s27 = smov 0  }
   0x7   :  { %s958_s28 = smov 0   ;;  %s960_s29 = smov 0  }
   0x8 LB: > { %s975_s5 = sadd.s32 4294967295, %s901_s29   ;;  %s671_s30 = sadd.s32 4294967294, %s901_s29   ;;  %s901_s29 = sphi %s960_s29, %s1163_s29   ;;  %s897_s28 = sphi %s958_s28, %s1162_s28   ;;  %s893_s27 = sphi %s956_s27, %s1161_s27   ;;  %s889_s26 = sphi %s954_s26, %s1160_s26  }
   0x9   : > { %s979_s8 = sadd.s32 1, %s901_s29   ;;  %s169_s9 = sadd.s32 1, %s897_s28 }
   0xa   : > { %s166_s10 = ssub.s32 %s901_s29, %s979_s8  ;;  %p179_p0 = scmp.ne.s32.totalorder %s897_s28, %s893_s27 }
   0xb   : > { %p167_p1 = scmp.eq.s32.totalorder %s166_s10, 0  ;;  %p180_p2 = scmp.eq.s32.totalorder %s975_s5, 1 }
   0xc   : > { %p185_p3 = scmp.ne.s32.totalorder %s893_s27, %s889_s26  ;;  %p186_p4 = scmp.eq.s32.totalorder %s671_s30, 1 }
   0xd   : > { %s990_s11 = scalar_select %p167_p1, %s897_s28, %s169_s9  }
   0xe   : > { %p992_p5 = por %p180_p2, %p179_p0  ;;  %p996_p6 = por %p186_p4, %p185_p3 }
   0xf   : > { %p672_p7 = scmp.ge.s32.totalorder %s901_s29, 1  ;;  %p219_p8 = scmp.lt.s32.totalorder %s901_s29, 3 }
  0x10   : > { %s1151_s12 = scalar_select %p992_p5, 1, 0 }
  0x11   : > { %s1152_s13 = scalar_select %p996_p6, 1, 0 }
  0x12   : > { %p1148_p9 = scmp.eq.s32.totalorder %s975_s5, 0  ;;  %p1003_p10 = pnand %p672_p7, %p219_p8 }
  0x13   : > { %s903_s15 = smov [#allocation3]   ;;  %s775_s20 = scalar_lea.hbm %s1142_s2, 256 }
  0x14   : > { %s1153_s14 = scalar_select %p1003_p10, 1, 0 }
  0x15   : > { %s231_s16 = sshll.u32 %s903_s15, 4  ;;  %p711_p11 = pneg %p1003_p10  ;;  %s232_s16 = int_to_ptr.vmem [resolvable:$true] %s231_s16 }
  0x16   : > { %p776_p13 = scmp.ne.s32.totalorder %s1142_s2, %s775_s20  ;;  %p782_p3 = scmp.lt.u32.totalorder %s775_s20, %s1142_s2 }
  0x17   : > { %p1011_p12 = pnand %p1148_p9, %p711_p11 }
  0x19   : > { %p777_p0 = pneg %p1011_p12 }
  0x1b   : > { %p778_p1 = pnand %p777_p0, %p776_p13 }
  0x1d   : > { %p779_p2 = pneg %p778_p1 }
  0x1f   : > { %p784_p4 = pnand %p782_p3, %p779_p2 }
  0x21   : > { %787 = shalt.err (!%p784_p4)
}
  0x22   : > { %s788_s25 = scalar_lea.vmem %s232_s16, 256  ;;  %p796_p9 = scmp.lt.s32.totalorder %s232_s16, %s232_s16 }
  0x23   : > { %p789_p7 = scmp.ne.s32.totalorder %s232_s16, %s788_s25  ;;  %p797_p6 = scmp.lt.s32.totalorder %s788_s25, %s788_s25 }
  0x25   : > { %p791_p8 = pnand %p789_p7, %p777_p0  ;;  %p798_p5 = por %p797_p6, %p796_p9 }
  0x27   : > { %p792_p11 = pneg %p791_p8 }
  0x29   : > { %p799_p10 = pnand %p798_p5, %p792_p11 }
  0x2b   : > { %802 = shalt.err (!%p799_p10)
}
  0x2c   : > { %s904_s30 = smov 128   ;;  %s905_s9 = smov 8  }
  0x2d   : > { %714 = dma.hbm_to_vmem [thread:$0]  (!%p1011_p12), %s1142_s2, 256, %s232_s16, [#allocation4], %s904_s30, %s904_s30, %s905_s9  }
  0x2e   : > { %p1155_p13 = scmp.ne.s32.totalorder %s1153_s14, 0 }
  0x2f   : > { %p1156_p1 = scmp.eq.s32.totalorder (!%p1155_p13), %s975_s5, 0 }
  0x30   : > { %270 = sbr.rel (%p1155_p13) target bundleno = 566 (0x236), region = 44 }
  0x37   : > { %876 = dma.done.wait (%p1156_p1), [#allocation4], 256   ;;  %p1157_p0 = pmov %p1156_p1 }
  0x38   : > { %p308_p5 = scmp.lt.s32.totalorder %s975_s5, 1  ;;  %v906_v0 = vmov 0   ;;  %vm331_vm0 = vcmask 261120   ;;  %v316_v2 = vld [vmem:[#allocation3] sm:$0xff]  ;;  %v317_v5 = vld [vmem:[#allocation3 + $0x8] sm:$0xff]  ;;  %v907_v8 = vmov 0.0  }
  0x39   : > { %878 = vsyncadd (%p1157_p0), [#allocation4], 4294967040  ;;  %763 = vset.pattern.permute.xlu0 %v906_v0  ;;  %764 = vset.pattern.permute.xlu1 %v906_v0  ;;  %v319_v3 = vld [vmem:[%s1143_s3] sm:$0xff]  ;;  %v320_v6 = vld [vmem:[%s1143_s3 + $0x8] sm:$0xff]  ;;  %vm908_vm1 = vmmov 0   ;;  %vm432_vm2 = vcmask 64512  }
  0x3a   : > { %s309_s17 = scalar_select %p308_p5, %s975_s5, 1  ;;  %695 = vmatprep.mubr.msk.f32.mxu0 %vm331_vm0, %v316_v2  ;;  %v418_v4 = vld [vmem:[%s1144_s4] sm:$0xff]  ;;  %323 = vperm.xlu0 %763, %v319_v3   ;;  %v419_v7 = vld [vmem:[%s1144_s4 + $0x8] sm:$0xff]  ;;  %vm532_vm3 = vcmask 57344  }
  0x3b   : > { %422 = vperm.xlu1 %764, %v418_v4   ;;  %698 = vmatprep.subr.mxu1 %v907_v8  ;;  %s1060_s19 = sand.u32 1, %s893_s27   ;;  %p1158_p9 = scmp.ne.s32.totalorder %s1151_s12, 0 }
  0x3c   : > { %s677_s18 = sshll.u32 %s309_s17, 3  ;;  %700 = vmatprep.mubr.msk.f32.mxu1 %vm908_vm1, %v907_v8  ;;  %s307_s20 = scalar_lea.vmem [#allocation7], %s1060_s19 }
  0x3d   : > { %s311_s16 = scalar_lea.vmem %s1140_s0, %s677_s18  ;;  %s315_s17 = scalar_lea.vmem %s1141_s1, %s677_s18 }
  0x3e   : > { %v318_v1 = vld [vmem:[%s311_s16] sm:$0xff]  ;;  %328 = vperm.xlu0 %763, %v320_v6   ;;  %s442_s18 = sld [smem:[#allocation2]]  ;;  %s684_s16 = sshll.u32 %s975_s5, 4 }
  0x3f   : > { %693 = vmatprep.subr.msk.mxu0 %vm331_vm0, %v318_v1  ;;  %427 = vperm.xlu1 %764, %v419_v7   ;;  %v454_v9 = vld [vmem:[%s315_s17] sm:$0xff]  ;;  %s1071_s22 = scalar_lea.hbm %s1147_s7, %s684_s16  ;;  %s564_s23 = sshll.u32 %s307_s20, 4  ;;  %s565_s23 = int_to_ptr.vmem [resolvable:$true] %s564_s23 }
  0x40   : > { %694 = vmatpush3.xpose.msk.msra.mxu0 %vm331_vm0, %v318_v1  ;;  %699 = vmatpush3.msra.mxu1 %v454_v9  ;;  %s539_s24 = scalar_lea.sflag [#allocation8], %s1060_s19  ;;  %s803_s25 = scalar_lea.vmem %s565_s23, 16 }
  0x41   : > { %p804_p6 = scmp.ne.s32.totalorder %s565_s23, %s803_s25  ;;  %s909_s30 = smov [#allocation7]  }
  0x42   : > { %s807_s9 = sshll.u32 %s909_s30, 4  ;;  %s808_s9 = int_to_ptr.vmem [resolvable:$false] %s807_s9 }
  0x43   : > { %696 = vmatmul.mubr.msk.f32.vlgmr.msra.gmra.mrb[0].mxu0 %vm331_vm0, %v317_v5  ;;  %p805_p10 = pnand %p804_p6, %p1158_p9  ;;  %s809_s10 = scalar_lea.vmem %s808_s9, 32 }
  0x44   : > { %v443_v30 = vstv %s442_s18  ;;  %p810_p2 = scmp.lt.s32.totalorder %s565_s23, %s808_s9  ;;  %p811_p3 = scmp.lt.s32.totalorder %s809_s10, %s803_s25 }
  0x45   : > { %p806_p12 = pneg %p805_p10 }
  0x46   : > { %p812_p4 = por %p811_p3, %p810_p2 }
  0x48   : > { %p813_p7 = pnand %p812_p4, %p806_p12 }
  0xb9   : > { %v324_v10 = vpop.permute.xlu0 %323 }
  0xba   : > { %v423_v16 = vpop.permute.xlu1 %422 }
  0xbd   : > { %v329_v11 = vpop.permute.xlu0 %328 }
  0xbe   : > { %v428_v18 = vpop.permute.xlu1 %427 }
 0x116   : > { %v697_v12 = vpop.f32.mrb[0].mxu0 }
 0x117   : > { %v413_v13 = vadd.f32 %v697_v12, %v329_v11  ;;  %v407_v14 = vpop.f32.mrb[1].mxu0 }
 0x118   : > { %v408_v15 = vadd.f32 %v407_v14, %v324_v10 }
 0x119   : > { %765 = vtanh.f32 %v413_v13 }
 0x11a   : > { %767 = vtanh.f32 %v408_v15 }
 0x123   : > { %v766_v17 = vpop.eup %765 }
 0x124   : > { %v768_v19 = vpop.eup %767  ;;  %v431_v20 = vmul.f32 %v766_v17, %v428_v18 }
 0x125   : > { %v430_v21 = vmul.f32 %v768_v19, %v423_v16 }
 0x126   : > { %v434_v22 = vsel %vm432_vm2, %v431_v20, 0.0 }
 0x127   : > { %v433_v23 = vsel %vm432_vm2, %v430_v21, 0.0 }
 0x128   : > { %v435_v24 = vadd.f32 %v434_v22, %v433_v23 }
 0x12a   : > { %v436_v25 = vrot.slane %v435_v24, 4 }
 0x12c   : > { %v437_v26 = vadd.f32 %v436_v25, %v435_v24 }
 0x12e   : > { %v438_v27 = vrot.slane %v437_v26, 2 }
 0x130   : > { %v439_v28 = vadd.f32 %v438_v27, %v437_v26 }
 0x132   : > { %v440_v29 = vrot.slane %v439_v28, 1 }
 0x134   : > { %v441_v31 = vadd.f32 %v440_v29, %v439_v28 }
 0x136   : > { %v444_v32 = vadd.f32 %v443_v30, %v441_v31 }
 0x138   : > { %v682_v33 = vmul.f32 -1.442695, %v444_v32 }
 0x13a   : > { %769 = vpow2.f32 %v682_v33 }
 0x144   : > { %v770_v34 = vpop.eup %769 }
 0x145   : > { %v448_v35 = vadd.f32 1.0, %v770_v34 }
 0x147   : > { %771 = vrcp.f32 %v448_v35 }
 0x151   : > { %v772_v36 = vpop.eup %771 }
 0x152   : > { %701 = vmatmul.mubr.msk.f32.vlgmr.msra.gmra.mrb[0].mxu1 %vm432_vm2, %v772_v36  ;;  %v451_v37 = vsel %vm432_vm2, %v772_v36, 0.0  ;;  %533 = vst.msk [vmem:[%s307_s20] sm:$0x1] %vm532_vm3, %v772_v36 }
 0x153   : > { %452 = vadd.xlane.f32.xlu0 %v451_v37 }
 0x154   : > { %816 = shalt.err (!%p813_p7)
}
 0x155   : > { %s817_s15 = scalar_lea.hbm %s1071_s22, 16  ;;  %s821_s20 = scalar_lea.hbm %s1147_s7, 32 }
 0x156   : > { %p818_p8 = scmp.ne.s32.totalorder %s1071_s22, %s817_s15  ;;  %p822_p1 = scmp.lt.u32.totalorder %s1071_s22, %s1147_s7 }
 0x157   : > { %p823_p0 = scmp.lt.u32.totalorder %s821_s20, %s817_s15  ;;  %p825_p6 = scmp.lt.u32.totalorder %s817_s15, %s1071_s22 }
 0x158   : > { %p819_p11 = pnand %p818_p8, %p1158_p9 }
 0x159   : > { %p824_p5 = por %p823_p0, %p822_p1 }
 0x15a   : > { %p820_p13 = pneg %p819_p11 }
 0x15b   : > { %p826_p10 = por %p825_p6, %p824_p5 }
 0x15d   : > { %p827_p12 = pnand %p826_p10, %p820_p13 }
 0x15f   : > { %830 = shalt.err (!%p827_p12)
}
 0x160   : > { %708 = dma.vmem_to_hbm [thread:$0]  (%p1158_p9), %s565_s23, 16, %s1071_s22, %s539_s24   ;;  %vm530_vm4 = vcmask 253952  }
 0x161   : > { %s301_s25 = scalar_lea.vmem [#allocation6], %s1060_s19  ;;  %s1097_s15 = scalar_lea.hbm %s1146_s6, %s684_s16 }
 0x162   : > { %s551_s30 = sshll.u32 %s301_s25, 4  ;;  %s535_s22 = scalar_lea.sflag [#allocation5], %s1060_s19  ;;  %s1099_s30 = int_to_ptr.vmem [resolvable:$true] %s551_s30 }
 0x163   : > { %s831_s23 = scalar_lea.vmem %s1099_s30, 16  ;;  %s910_s24 = smov [#allocation6]  }
 0x164   : > { %p832_p2 = scmp.ne.s32.totalorder %s1099_s30, %s831_s23  ;;  %s835_s17 = sshll.u32 %s910_s24, 4  ;;  %s836_s17 = int_to_ptr.vmem [resolvable:$false] %s835_s17 }
 0x165   : > { %s837_s5 = scalar_lea.vmem %s836_s17, 32  ;;  %p838_p7 = scmp.lt.s32.totalorder %s1099_s30, %s836_s17 }
 0x166   : > { %p833_p3 = pnand %p832_p2, %p1158_p9  ;;  %p839_p8 = scmp.lt.s32.totalorder %s837_s5, %s831_s23 }
 0x168   : > { %p834_p4 = pneg %p833_p3  ;;  %p840_p11 = por %p839_p8, %p838_p7 }
 0x16a   : > { %p841_p13 = pnand %p840_p11, %p834_p4 }
 0x1e0   : > { %v453_v38 = vpop.xlane.xlu0 %452 }
 0x1e1   : > { %773 = vrcp.f32 %v453_v38 }
 0x1eb   : > { %v774_v39 = vpop.eup %773 }
 0x225   : > { %v524_v40 = vpop.f32.mrb[0].mxu1 }
 0x226   : > { %v529_v41 = vmul.f32 %v774_v39, %v524_v40  ;;  %v702_v42 = vpop.f32.mrb[1].mxu1 }
 0x228   : > { %531 = vst.msk [vmem:[%s301_s25] sm:$0x1] %vm530_vm4, %v529_v41 }
 0x229   : > { %844 = shalt.err (!%p841_p13)
}
 0x22a   : > { %s845_s19 = scalar_lea.hbm %s1097_s15, 16  ;;  %s849_s20 = scalar_lea.hbm %s1146_s6, 32 }
 0x22b   : > { %p846_p1 = scmp.ne.s32.totalorder %s1097_s15, %s845_s19  ;;  %p850_p6 = scmp.lt.u32.totalorder %s1097_s15, %s1146_s6 }
 0x22c   : > { %p851_p10 = scmp.lt.u32.totalorder %s849_s20, %s845_s19  ;;  %p853_p2 = scmp.lt.u32.totalorder %s845_s19, %s1097_s15 }
 0x22d   : > { %p847_p0 = pnand %p846_p1, %p1158_p9 }
 0x22e   : > { %p852_p12 = por %p851_p10, %p850_p6 }
 0x22f   : > { %p848_p5 = pneg %p847_p0 }
 0x230   : > { %p854_p3 = por %p853_p2, %p852_p12 }
 0x232   : > { %p855_p4 = pnand %p854_p3, %p848_p5 }
 0x234   : > { %858 = shalt.err (!%p855_p4)
}
 0x235   : > { %707 = dma.vmem_to_hbm [thread:$0]  (%p1158_p9), %s1099_s30, 16, %s1097_s15, %s535_s22  }
 0x236 PF: > { %p724_p7 = scmp.ge.s32.totalorder %s901_s29, 2  ;;  %s576_s25 = sand.u32 1, %s889_s26  }
 0x237   : > { %p1159_p8 = scmp.ne.s32.totalorder %s1152_s13, 0  ;;  %s577_s9 = scalar_lea.sflag [#allocation5], %s576_s25 }
 0x239   : > { %p716_p11 = pnand %p724_p7, %p1159_p8 }
 0x23b   : > { %880 = dma.done.wait (!%p716_p11), %s577_s9, 16  }
 0x23c   : > { %882 = vsyncadd (!%p716_p11), %s577_s9, 4294967280  ;;  %s585_s10 = scalar_lea.sflag [#allocation8], %s576_s25 }
 0x23d   : > { %884 = dma.done.wait (!%p716_p11), %s585_s10, 16  }
 0x23e   : > { %886 = vsyncadd (!%p716_p11), %s585_s10, 4294967280  ;;  %p23_p9 = scmp.ge.s32.totalorder %s979_s8, 4   ;;  %s1160_s26 = smov %s893_s27 }
 0x23f   : > { %s1161_s27 = smov %s897_s28  ;;  %s1162_s28 = smov %s990_s11 }
 0x240   : > { %s1163_s29 = smov %s979_s8  ;;  %25 = sbr.rel (!%p23_p9) target bundleno = 8 (0x8), region = 104 }
 0x247   :  { %589 = vsyncpa [#allocation4], 1 }
 0x248   :  { %591 = vsyncpa [#allocation4 + $0x1], 1 }
 0x249   :  { %592 = vsyncpa [#allocation5], 1 }
 0x24a   :  { %594 = vsyncpa [#allocation5 + $0x1], 1 }
 0x24b   :  { %595 = vsyncpa [#allocation8], 1 }
 0x24c   :  { %597 = vsyncpa [#allocation8 + $0x1], 1 }

</bundles_post_ra>
